<compile_context>
chip_gen: v7x
topology: tpu7x:2x2x1
jax: 0.10.0
libtpu: 0.0.40
codegen_flags: <defaults>
</compile_context>

<pallas_src>
import jax
import jax.numpy as jnp
from jax.experimental import pallas as pl
from jax.experimental.pallas import tpu as pltpu


IN_F = 4    # fc1 in_features
HID = 5     # fc1 out_features
OUT_F = 3   # fc2 out_features

_LANE = 128
_DEFAULT_MAX_LANES = 128 * 1024   # 128K lanes/tile (f32): ~16 MiB double-buffered


def _round_up(x, m):
    return ((x + m - 1) // m) * m


def _net_kernel(wc_ref, bc_ref, x_ref, o_ref):
    """Fused (Linear(4,5) -> Linear(5,3)) + sigmoid, batch in the lane dim.

    wc_ref : (3, 4)   SMEM  -- fused weight  w2 @ w1
    bc_ref : (3,)     SMEM  -- fused bias    w2 @ b1 + b2
    x_ref  : (4, TB)  VMEM  -- input tile, batch along lanes
    o_ref  : (3, TB)  VMEM  -- output tile, batch along lanes
    """
    x = x_ref[...]                                   # (4, TB)
    for j in range(OUT_F):
        # 4 scalar*vector FMAs per output row (12 total) on the VPU;
        # sigmoid's exp/recip go to the EUP. Store each row directly
        # (no concatenate -> no extra sublane copies / temporaries).
        acc = bc_ref[j] + wc_ref[j, 0] * x[0:1, :]
        acc = acc + wc_ref[j, 1] * x[1:2, :]
        acc = acc + wc_ref[j, 2] * x[2:3, :]
        acc = acc + wc_ref[j, 3] * x[3:4, :]
        o_ref[j:j + 1, :] = jax.nn.sigmoid(acc).astype(o_ref.dtype)


def _fused_params(w1, b1, w2, b2):
    # Exact same math as the two-layer forward (fp reorder only).
    wc = jnp.dot(w2, w1)                    # (3, 4)
    bc = jnp.dot(w2, b1) + b2               # (3,)
    return wc.astype(jnp.float32), bc.astype(jnp.float32)


def _pick_tile(batch, max_lanes):
    # Biggest lane tile that (a) fits the cap and (b) leaves >= 2 grid steps
    # for large batches so v7x's two TensorCores both get work.
    tb = min(max_lanes, _round_up(max(pl.cdiv(batch, 2), 1), _LANE))
    return max(tb, _LANE)


def _call_kernel(xt, wc, bc, tb, out_dtype):
    """xt: (4, b_pad) with b_pad % tb == 0. Returns (3, b_pad)."""
    b_pad = xt.shape[1]
    n_b = b_pad // tb

    # Real (sublane-padded) VMEM footprint: (4,tb) and (3,tb) f32 blocks each
    # occupy 8 sublanes, double-buffered -> 2 bufs * 2 arrays * 8 * tb * 4 B.
    vmem_needed = 2 * 2 * 8 * tb * 4
    vmem_limit = int(min(max(vmem_needed + (4 << 20), 16 << 20), 48 << 20))

    cost = pl.CostEstimate(
        flops=27 * b_pad,                       # 24B matmul + 3B bias adds
        transcendentals=3 * b_pad,              # sigmoid exp per output elem
        bytes_accessed=(IN_F + OUT_F) * 4 * b_pad,
    )

    return pl.pallas_call(
        _net_kernel,
        out_shape=jax.ShapeDtypeStruct((OUT_F, b_pad), out_dtype),
        grid=(n_b,),
        in_specs=[
            pl.BlockSpec(memory_space=pltpu.MemorySpace.SMEM),   # wc (3,4)
            pl.BlockSpec(memory_space=pltpu.MemorySpace.SMEM),   # bc (3,)
            pl.BlockSpec((IN_F, tb), lambda i: (0, i)),          # x tile
        ],
        out_specs=pl.BlockSpec((OUT_F, tb), lambda i: (0, i)),
        compiler_params=pltpu.CompilerParams(
            dimension_semantics=("parallel",),
            vmem_limit_bytes=vmem_limit,
        ),
        cost_estimate=cost,
    )(wc, bc, xt)


def net_forward(x, w1, b1, w2, b2, *, max_lanes=_DEFAULT_MAX_LANES,
                out_dtype=None):
    """Equivalent of Net.forward: x (B, 4) -> (B, 3), PyTorch-style params."""
    B = x.shape[0]
    out_dtype = out_dtype if out_dtype is not None else x.dtype
    wc, bc = _fused_params(w1, b1, w2, b2)

    tb = _pick_tile(B, max_lanes)
    b_pad = _round_up(B, tb)

    # Fuse batch-padding into the transpose: one extra HBM pass, not two.
    xp = x if b_pad == B else jnp.pad(x, ((0, b_pad - B), (0, 0)))
    xt = xp.T                                                    # (4, b_pad)

    out_t = _call_kernel(xt, wc, bc, tb, out_dtype)              # (3, b_pad)
    # Slice + transpose fuse into a single pass back to caller layout.
    return out_t[:, :B].T                                        # (B, 3)


def net_forward_features_major(xt, w1, b1, w2, b2, *,
                               max_lanes=_DEFAULT_MAX_LANES, out_dtype=None):
    """Transpose-free path if the caller keeps a features-major layout:
    xt (4, B) -> (3, B). Avoids all wrapper-side HBM transpose passes."""
    B = xt.shape[1]
    out_dtype = out_dtype if out_dtype is not None else xt.dtype
    wc, bc = _fused_params(w1, b1, w2, b2)

    tb = _pick_tile(B, max_lanes)
    b_pad = _round_up(B, tb)
    if b_pad != B:
        xt = jnp.pad(xt, ((0, 0), (0, b_pad - B)))

    out_t = _call_kernel(xt, wc, bc, tb, out_dtype)
    return out_t[:, :B] if b_pad != B else out_t


def init_params(key):
    # Deterministic init mimicking PyTorch nn.Linear defaults:
    # U(-1/sqrt(fan_in), 1/sqrt(fan_in)) for both weight and bias.
    k1, k2, k3, k4 = jax.random.split(key, 4)
    bound1 = 1.0 / jnp.sqrt(4.0)
    bound2 = 1.0 / jnp.sqrt(5.0)
    w1 = jax.random.uniform(k1, (HID, IN_F), jnp.float32, -bound1, bound1)
    b1 = jax.random.uniform(k2, (HID,), jnp.float32, -bound1, bound1)
    w2 = jax.random.uniform(k3, (OUT_F, HID), jnp.float32, -bound2, bound2)
    b2 = jax.random.uniform(k4, (OUT_F,), jnp.float32, -bound2, bound2)
    return w1, b1, w2, b2


if __name__ == "__main__":
    key = jax.random.PRNGKey(0)
    k_params, k_x1, k_x2 = jax.random.split(key, 3)

    w1, b1, w2, b2 = init_params(k_params)

    # Small shape matching the module contract: batch=8, in_features=4.
    x = jax.random.normal(k_x1, (8, IN_F), jnp.float32)
    out = jax.block_until_ready(net_forward(x, w1, b1, w2, b2))
    ref = jax.nn.sigmoid((x @ w1.T + b1) @ w2.T + b2)
    assert out.shape == (8, OUT_F)
    assert jnp.allclose(out, ref, atol=1e-5, rtol=1e-5)

    # Exercise the multi-tile / padded path and the features-major entry point.
    x2 = jax.random.normal(k_x2, (300, IN_F), jnp.float32)
    out2 = jax.block_until_ready(net_forward(x2, w1, b1, w2, b2))
    out2_fm = jax.block_until_ready(
        net_forward_features_major(x2.T, w1, b1, w2, b2))
    ref2 = jax.nn.sigmoid((x2 @ w1.T + b1) @ w2.T + b2)
    assert out2.shape == (300, OUT_F)
    assert jnp.allclose(out2, ref2, atol=1e-5, rtol=1e-5)
    assert jnp.allclose(out2_fm.T, ref2, atol=1e-5, rtol=1e-5)

    print("KERNEL_OK")
</pallas_src>

<mosaic_0001>
module attributes {stable_mosaic.version = 11 : i64} {
  func.func @_net_kernel(%arg0: i32, %arg1: memref<3x4xf32, #tpu.memory_space<smem>>, %arg2: memref<3xf32, #tpu.memory_space<smem>>, %arg3: memref<4x128xf32, #tpu.memory_space<vmem>>, %arg4: memref<3x128xf32, #tpu.memory_space<vmem>>) attributes {dimension_semantics = [#tpu.dimension_semantics<parallel>], iteration_bounds = array<i64: 1>, scalar_prefetch = 0 : i64, scratch_operands = 0 : i64, tpu.core_type = #tpu.core_type<tc>, window_params = [{transform_indices = @transform_0, window_bounds = array<i64: 3, 4>}, {transform_indices = @transform_1, window_bounds = array<i64: 3>}, {transform_indices = @transform_2, window_bounds = array<i64: 4, 128>}, {transform_indices = @transform_3, window_bounds = array<i64: 3, 128>}]} {
    %c0 = arith.constant 0 : index
    %c0_0 = arith.constant 0 : index
    %0 = vector.load %arg3[%c0, %c0_0] : memref<4x128xf32, #tpu.memory_space<vmem>>, vector<4x128xf32>
    %c0_1 = arith.constant 0 : index
    %1 = memref.load %arg2[%c0_1] : memref<3xf32, #tpu.memory_space<smem>>
    %c0_2 = arith.constant 0 : index
    %c0_3 = arith.constant 0 : index
    %2 = memref.load %arg1[%c0_2, %c0_3] : memref<3x4xf32, #tpu.memory_space<smem>>
    %3 = vector.extract_strided_slice %0 {offsets = [0, 0], sizes = [1, 128], strides = [1, 1]} : vector<4x128xf32> to vector<1x128xf32>
    %4 = vector.broadcast %2 : f32 to vector<1x128xf32>
    %5 = arith.mulf %4, %3 : vector<1x128xf32>
    %6 = vector.broadcast %1 : f32 to vector<1x128xf32>
    %7 = arith.addf %6, %5 : vector<1x128xf32>
    %c0_4 = arith.constant 0 : index
    %c1 = arith.constant 1 : index
    %8 = memref.load %arg1[%c0_4, %c1] : memref<3x4xf32, #tpu.memory_space<smem>>
    %9 = vector.extract_strided_slice %0 {offsets = [1, 0], sizes = [1, 128], strides = [1, 1]} : vector<4x128xf32> to vector<1x128xf32>
    %10 = vector.broadcast %8 : f32 to vector<1x128xf32>
    %11 = arith.mulf %10, %9 : vector<1x128xf32>
    %12 = arith.addf %7, %11 : vector<1x128xf32>
    %c0_5 = arith.constant 0 : index
    %c2 = arith.constant 2 : index
    %13 = memref.load %arg1[%c0_5, %c2] : memref<3x4xf32, #tpu.memory_space<smem>>
    %14 = vector.extract_strided_slice %0 {offsets = [2, 0], sizes = [1, 128], strides = [1, 1]} : vector<4x128xf32> to vector<1x128xf32>
    %15 = vector.broadcast %13 : f32 to vector<1x128xf32>
    %16 = arith.mulf %15, %14 : vector<1x128xf32>
    %17 = arith.addf %12, %16 : vector<1x128xf32>
    %c0_6 = arith.constant 0 : index
    %c3 = arith.constant 3 : index
    %18 = memref.load %arg1[%c0_6, %c3] : memref<3x4xf32, #tpu.memory_space<smem>>
    %19 = vector.extract_strided_slice %0 {offsets = [3, 0], sizes = [1, 128], strides = [1, 1]} : vector<4x128xf32> to vector<1x128xf32>
    %20 = vector.broadcast %18 : f32 to vector<1x128xf32>
    %21 = arith.mulf %20, %19 : vector<1x128xf32>
    %22 = arith.addf %17, %21 : vector<1x128xf32>
    %23 = arith.negf %22 : vector<1x128xf32>
    %24 = math.exp %23 : vector<1x128xf32>
    %cst = arith.constant 1.000000e+00 : f32
    %25 = vector.broadcast %cst : f32 to vector<1x128xf32>
    %26 = arith.addf %25, %24 : vector<1x128xf32>
    %27 = arith.divf %25, %26 : vector<1x128xf32>
    %c0_7 = arith.constant 0 : index
    %c0_8 = arith.constant 0 : index
    %28 = vector.load %arg4[%c0_7, %c0_8] : memref<3x128xf32, #tpu.memory_space<vmem>>, vector<1x128xf32>
    tpu.vector_store %arg4[%c0_7, %c0_8], %27 {strides = array<i32>} : memref<3x128xf32, #tpu.memory_space<vmem>>, vector<1x128xf32>,
    %c1_9 = arith.constant 1 : index
    %29 = memref.load %arg2[%c1_9] : memref<3xf32, #tpu.memory_space<smem>>
    %c1_10 = arith.constant 1 : index
    %c0_11 = arith.constant 0 : index
    %30 = memref.load %arg1[%c1_10, %c0_11] : memref<3x4xf32, #tpu.memory_space<smem>>
    %31 = vector.extract_strided_slice %0 {offsets = [0, 0], sizes = [1, 128], strides = [1, 1]} : vector<4x128xf32> to vector<1x128xf32>
    %32 = vector.broadcast %30 : f32 to vector<1x128xf32>
    %33 = arith.mulf %32, %31 : vector<1x128xf32>
    %34 = vector.broadcast %29 : f32 to vector<1x128xf32>
    %35 = arith.addf %34, %33 : vector<1x128xf32>
    %c1_12 = arith.constant 1 : index
    %c1_13 = arith.constant 1 : index
    %36 = memref.load %arg1[%c1_12, %c1_13] : memref<3x4xf32, #tpu.memory_space<smem>>
    %37 = vector.extract_strided_slice %0 {offsets = [1, 0], sizes = [1, 128], strides = [1, 1]} : vector<4x128xf32> to vector<1x128xf32>
    %38 = vector.broadcast %36 : f32 to vector<1x128xf32>
    %39 = arith.mulf %38, %37 : vector<1x128xf32>
    %40 = arith.addf %35, %39 : vector<1x128xf32>
    %c1_14 = arith.constant 1 : index
    %c2_15 = arith.constant 2 : index
    %41 = memref.load %arg1[%c1_14, %c2_15] : memref<3x4xf32, #tpu.memory_space<smem>>
    %42 = vector.extract_strided_slice %0 {offsets = [2, 0], sizes = [1, 128], strides = [1, 1]} : vector<4x128xf32> to vector<1x128xf32>
    %43 = vector.broadcast %41 : f32 to vector<1x128xf32>
    %44 = arith.mulf %43, %42 : vector<1x128xf32>
    %45 = arith.addf %40, %44 : vector<1x128xf32>
    %c1_16 = arith.constant 1 : index
    %c3_17 = arith.constant 3 : index
    %46 = memref.load %arg1[%c1_16, %c3_17] : memref<3x4xf32, #tpu.memory_space<smem>>
    %47 = vector.extract_strided_slice %0 {offsets = [3, 0], sizes = [1, 128], strides = [1, 1]} : vector<4x128xf32> to vector<1x128xf32>
    %48 = vector.broadcast %46 : f32 to vector<1x128xf32>
    %49 = arith.mulf %48, %47 : vector<1x128xf32>
    %50 = arith.addf %45, %49 : vector<1x128xf32>
    %51 = arith.negf %50 : vector<1x128xf32>
    %52 = math.exp %51 : vector<1x128xf32>
    %cst_18 = arith.constant 1.000000e+00 : f32
    %53 = vector.broadcast %cst_18 : f32 to vector<1x128xf32>
    %54 = arith.addf %53, %52 : vector<1x128xf32>
    %55 = arith.divf %53, %54 : vector<1x128xf32>
    %c1_19 = arith.constant 1 : index
    %c0_20 = arith.constant 0 : index
    %56 = vector.load %arg4[%c1_19, %c0_20] : memref<3x128xf32, #tpu.memory_space<vmem>>, vector<1x128xf32>
    tpu.vector_store %arg4[%c1_19, %c0_20], %55 {strides = array<i32>} : memref<3x128xf32, #tpu.memory_space<vmem>>, vector<1x128xf32>,
    %c2_21 = arith.constant 2 : index
    %57 = memref.load %arg2[%c2_21] : memref<3xf32, #tpu.memory_space<smem>>
    %c2_22 = arith.constant 2 : index
    %c0_23 = arith.constant 0 : index
    %58 = memref.load %arg1[%c2_22, %c0_23] : memref<3x4xf32, #tpu.memory_space<smem>>
    %59 = vector.extract_strided_slice %0 {offsets = [0, 0], sizes = [1, 128], strides = [1, 1]} : vector<4x128xf32> to vector<1x128xf32>
    %60 = vector.broadcast %58 : f32 to vector<1x128xf32>
    %61 = arith.mulf %60, %59 : vector<1x128xf32>
    %62 = vector.broadcast %57 : f32 to vector<1x128xf32>
    %63 = arith.addf %62, %61 : vector<1x128xf32>
    %c2_24 = arith.constant 2 : index
    %c1_25 = arith.constant 1 : index
    %64 = memref.load %arg1[%c2_24, %c1_25] : memref<3x4xf32, #tpu.memory_space<smem>>
    %65 = vector.extract_strided_slice %0 {offsets = [1, 0], sizes = [1, 128], strides = [1, 1]} : vector<4x128xf32> to vector<1x128xf32>
    %66 = vector.broadcast %64 : f32 to vector<1x128xf32>
    %67 = arith.mulf %66, %65 : vector<1x128xf32>
    %68 = arith.addf %63, %67 : vector<1x128xf32>
    %c2_26 = arith.constant 2 : index
    %c2_27 = arith.constant 2 : index
    %69 = memref.load %arg1[%c2_26, %c2_27] : memref<3x4xf32, #tpu.memory_space<smem>>
    %70 = vector.extract_strided_slice %0 {offsets = [2, 0], sizes = [1, 128], strides = [1, 1]} : vector<4x128xf32> to vector<1x128xf32>
    %71 = vector.broadcast %69 : f32 to vector<1x128xf32>
    %72 = arith.mulf %71, %70 : vector<1x128xf32>
    %73 = arith.addf %68, %72 : vector<1x128xf32>
    %c2_28 = arith.constant 2 : index
    %c3_29 = arith.constant 3 : index
    %74 = memref.load %arg1[%c2_28, %c3_29] : memref<3x4xf32, #tpu.memory_space<smem>>
    %75 = vector.extract_strided_slice %0 {offsets = [3, 0], sizes = [1, 128], strides = [1, 1]} : vector<4x128xf32> to vector<1x128xf32>
    %76 = vector.broadcast %74 : f32 to vector<1x128xf32>
    %77 = arith.mulf %76, %75 : vector<1x128xf32>
    %78 = arith.addf %73, %77 : vector<1x128xf32>
    %79 = arith.negf %78 : vector<1x128xf32>
    %80 = math.exp %79 : vector<1x128xf32>
    %cst_30 = arith.constant 1.000000e+00 : f32
    %81 = vector.broadcast %cst_30 : f32 to vector<1x128xf32>
    %82 = arith.addf %81, %80 : vector<1x128xf32>
    %83 = arith.divf %81, %82 : vector<1x128xf32>
    %c2_31 = arith.constant 2 : index
    %c0_32 = arith.constant 0 : index
    %84 = vector.load %arg4[%c2_31, %c0_32] : memref<3x128xf32, #tpu.memory_space<vmem>>, vector<1x128xf32>
    tpu.vector_store %arg4[%c2_31, %c0_32], %83 {strides = array<i32>} : memref<3x128xf32, #tpu.memory_space<vmem>>, vector<1x128xf32>,
    return
  }
  func.func @transform_0(%arg0: i32) -> (i32, i32) {
    %c0_i32 = arith.constant 0 : i32
    %c0_i32_0 = arith.constant 0 : i32
    %c0_i32_1 = arith.constant 0 : i32
    return %c0_i32, %c0_i32_0 : i32, i32
  }
  func.func @transform_1(%arg0: i32) -> i32 {
    %c0_i32 = arith.constant 0 : i32
    %c0_i32_0 = arith.constant 0 : i32
    return %c0_i32 : i32
  }
  func.func @transform_2(%arg0: i32) -> (i32, i32) {
    %c0_i32 = arith.constant 0 : i32
    %c0_i32_0 = arith.constant 0 : i32
    return %c0_i32, %arg0 : i32, i32
  }
  func.func @transform_3(%arg0: i32) -> (i32, i32) {
    %c0_i32 = arith.constant 0 : i32
    %c0_i32_0 = arith.constant 0 : i32
    return %c0_i32, %arg0 : i32, i32
  }
}

</mosaic_0001>

<bundles_post_ra>
// kernel: tpu_custom_call.1
= control target key start
LH: loop header
LB: loop body
LE: loop exit
PB: predicated region body
PF: predicated region fallthrough
CT: control target
= control target key end

     0   :  { %8 = vsyncpa [#allocation4], 0  ;;  %s312_s0 = inlined_call_operand.hbm [shape: f32[3,4], index: 0, kind: input, shape index: {}]   ;;  %s313_s1 = inlined_call_operand.vmem [shape: f32[3], index: 1, kind: input, shape index: {}]   ;;  %s314_s2 = inlined_call_operand.vmem [shape: f32[4,128], index: 2, kind: input, shape index: {}]   ;;  %s315_s3 = inlined_call_operand.hbm [shape: f32[3,128], index: 3, kind: output, shape index: {}]  }
   0x1   :  { %9 = vsyncpa [#allocation5], 0 }
   0x2   :  { %10 = vsyncpa [#allocation3], 0  ;;  %s25_s14 = sshll.u32 %s313_s1, 4  ;;  %s188_s17 = scalar_lea.hbm %s312_s0, 64  ;;  %s26_s14 = int_to_ptr.vmem [resolvable:$true] %s25_s14 }
   0x3   :  { %p189_p0 = scmp.ne.s32.totalorder %s312_s0, %s188_s17  ;;  %p192_p1 = scmp.lt.u32.totalorder %s188_s17, %s312_s0 }
   0x5   :  { %p194_p2 = pnand %p192_p1, %p189_p0 }
   0x7   :  { %197 = shalt.err (!%p194_p2)
}
   0x8   :  { %s238_s22 = smov [#allocation2]   ;;  %s198_s1 = scalar_lea.vmem %s26_s14, 16 }
   0x9   :  { %18 = dma.hbm_to_smem %s312_s0, 64, %s238_s22, [#allocation4]  }
   0xa   :  { %p199_p3 = scmp.ne.s32.totalorder %s26_s14, %s198_s1  ;;  %p203_p4 = scmp.lt.s32.totalorder %s26_s14, %s26_s14 }
   0xb   :  { %p204_p5 = scmp.lt.s32.totalorder %s198_s1, %s198_s1 }
   0xd   :  { %p205_p6 = por %p204_p5, %p203_p4 }
   0xf   :  { %p206_p7 = pnand %p205_p6, %p199_p3 }
  0x11   :  { %209 = shalt.err (!%p206_p7)
}
  0x12   :  { %s239_s25 = smov [#allocation6]  }
  0x13   :  { %28 = dma.vmem_to_smem %s26_s14, 16, %s239_s25, [#allocation5]  }
  0x14   :  { %232 = dma.done.wait [#allocation4], 64  }
  0x15   :  { %233 = vsyncadd [#allocation4], 4294967232 }
  0x16   :  { %234 = dma.done.wait [#allocation5], 16  }
  0x17   :  { %235 = vsyncadd [#allocation5], 4294967280 }
  0x18   :  { %37 = sfence }
  0x19   :  { %s39_s26 = sld [smem:[#allocation6]]  ;;  %s157_s28 = sld [smem:[#allocation2 + $0x1]]  ;;  %v38_v0 = vld [vmem:[%s314_s2] sm:$0xf] }
  0x1a   :  { %s40_s27 = sld [smem:[#allocation2]]  ;;  %s158_s29 = sld [smem:[#allocation2 + $0x2]] }
  0x1b   :  { %s159_s0 = sld [smem:[#allocation2 + $0x3]]  ;;  %s276_s30 = sld [smem:[#allocation6 + $0x1]] }
  0x1c   :  { %s162_s4 = sld [smem:[#allocation2 + $0x80]]  ;;  %s163_s5 = sld [smem:[#allocation2 + $0x81]] }
  0x1d   :  { %s281_s8 = sld [smem:[#allocation2 + $0x82]]  ;;  %s283_s9 = sld [smem:[#allocation2 + $0x83]] }
  0x1e   :  { %s285_s10 = sld [smem:[#allocation6 + $0x2]]  ;;  %s168_s11 = sld [smem:[#allocation2 + $0x100]] }
  0x1f   :  { %v43_v2 = vstv %s39_s26  ;;  %s287_s12 = sld [smem:[#allocation2 + $0x101]]  ;;  %v46_v4 = vstv %s157_s28  ;;  %s289_s13 = sld [smem:[#allocation2 + $0x102]] }
  0x20   :  { %v41_v1 = vstv %s40_s27  ;;  %v53_v5 = vstv %s158_s29  ;;  %s291_s2 = sld [smem:[#allocation2 + $0x103]]  ;;  %v47_v6 = vmul.f32 %v46_v4, %v38_v0  ;;  %s240_s14 = smov [#allocation7]  }
  0x21   :  { %v42_v3 = vmul.f32 %v41_v1, %v38_v0  ;;  %v54_v7 = vmul.f32 %v53_v5, %v38_v0  ;;  %v60_v8 = vstv %s159_s0  ;;  %v77_v9 = vstv %s276_s30  ;;  %s147_s15 = sshll.u32 %s240_s14, 4  ;;  %s148_s15 = int_to_ptr.vmem [resolvable:$true] %s147_s15 }
  0x22   :  { %v61_v11 = vmul.f32 %v60_v8, %v38_v0  ;;  %v75_v12 = vstv %s162_s4  ;;  %v80_v13 = vstv %s163_s5  ;;  %v49_v14 = vrot.slane %v47_v6, 1  ;;  %s210_s16 = scalar_lea.vmem %s148_s15, 64  ;;  %p215_p9 = scmp.lt.s32.totalorder %s148_s15, %s148_s15 }
  0x23   :  { %v44_v10 = vadd.f32 %v43_v2, %v42_v3  ;;  %v56_v15 = vrot.slane %v54_v7, 2  ;;  %v76_v16 = vmul.f32 %v75_v12, %v38_v0  ;;  %v81_v17 = vmul.f32 %v80_v13, %v38_v0  ;;  %p211_p8 = scmp.ne.s32.totalorder %s148_s15, %s210_s16  ;;  %p216_p10 = scmp.lt.s32.totalorder %s210_s16, %s210_s16 }
  0x24   :  { %v63_v18 = vrot.slane %v61_v11, 3  ;;  %v87_v19 = vstv %s281_s8  ;;  %v94_v20 = vstv %s283_s9  ;;  %v109_v21 = vstv %s168_s11 }
  0x25   :  { %v51_v22 = vadd.f32 %v49_v14, %v44_v10  ;;  %v78_v23 = vadd.f32 %v77_v9, %v76_v16  ;;  %v83_v24 = vrot.slane %v81_v17, 1  ;;  %v88_v25 = vmul.f32 %v87_v19, %v38_v0  ;;  %p217_p11 = por %p216_p10, %p215_p9 }
  0x26   :  { %v95_v26 = vmul.f32 %v94_v20, %v38_v0  ;;  %v110_v27 = vmul.f32 %v109_v21, %v38_v0  ;;  %v111_v28 = vstv %s285_s10  ;;  %v114_v29 = vstv %s287_s12 }
  0x27   :  { %v58_v30 = vadd.f32 %v56_v15, %v51_v22  ;;  %v85_v31 = vadd.f32 %v83_v24, %v78_v23  ;;  %v90_v32 = vrot.slane %v88_v25, 2  ;;  %v115_v33 = vmul.f32 %v114_v29, %v38_v0  ;;  %p218_p12 = pnand %p217_p11, %p211_p8 }
  0x28   :  { %v97_v34 = vrot.slane %v95_v26, 3  ;;  %v112_v35 = vadd.f32 %v111_v28, %v110_v27  ;;  %v121_v36 = vstv %s289_s13  ;;  %v128_v37 = vstv %s291_s2 }
  0x29   :  { %v65_v38 = vadd.f32 %v63_v18, %v58_v30  ;;  %v92_v39 = vadd.f32 %v90_v32, %v85_v31  ;;  %v117_v40 = vrot.slane %v115_v33, 1  ;;  %v122_v41 = vmul.f32 %v121_v36, %v38_v0 }
  0x2a   :  { %v129_v42 = vmul.f32 %v128_v37, %v38_v0 }
  0x2b   :  { %v160_v43 = vmul.f32 -1.442695, %v65_v38  ;;  %v99_v44 = vadd.f32 %v97_v34, %v92_v39  ;;  %v119_v45 = vadd.f32 %v117_v40, %v112_v35  ;;  %v124_v46 = vrot.slane %v122_v41, 2 }
  0x2c   :  { %v131_v47 = vrot.slane %v129_v42, 3 }
  0x2d   :  { %176 = vpow2.f32 %v160_v43  ;;  %v166_v48 = vmul.f32 -1.442695, %v99_v44  ;;  %v126_v49 = vadd.f32 %v124_v46, %v119_v45 }
  0x2f   :  { %178 = vpow2.f32 %v166_v48  ;;  %v133_v50 = vadd.f32 %v131_v47, %v126_v49 }
  0x31   :  { %v172_v51 = vmul.f32 -1.442695, %v133_v50 }
  0x33   :  { %180 = vpow2.f32 %v172_v51 }
  0x37   :  { %v177_v52 = vpop.eup %176 }
  0x38   :  { %v69_v53 = vadd.f32 1.0, %v177_v52 }
  0x39   :  { %v179_v54 = vpop.eup %178 }
  0x3a   :  { %182 = vrcp.f32 %v69_v53  ;;  %v103_v55 = vadd.f32 1.0, %v179_v54 }
  0x3c   :  { %184 = vrcp.f32 %v103_v55 }
  0x3d   :  { %v181_v56 = vpop.eup %180 }
  0x3e   :  { %v137_v57 = vadd.f32 1.0, %v181_v56 }
  0x40   :  { %186 = vrcp.f32 %v137_v57 }
  0x44   :  { %v183_v58 = vpop.eup %182 }
  0x45   :  { %72 = vst [vmem:[#allocation7] sm:$0x1] %v183_v58 }
  0x46   :  { %v185_v59 = vpop.eup %184 }
  0x47   :  { %106 = vst [vmem:[#allocation7 + $0x1] sm:$0x1] %v185_v59 }
  0x4a   :  { %v187_v60 = vpop.eup %186 }
  0x4b   :  { %140 = vst [vmem:[#allocation7 + $0x2] sm:$0x1] %v187_v60 }
  0x4c   :  { %221 = shalt.err (!%p218_p12)
}
  0x4d   :  { %s222_s19 = scalar_lea.hbm %s315_s3, 64 }
  0x4e   :  { %p223_p13 = scmp.ne.s32.totalorder %s315_s3, %s222_s19  ;;  %p226_p0 = scmp.lt.u32.totalorder %s222_s19, %s315_s3 }
  0x50   :  { %p228_p1 = pnand %p226_p0, %p223_p13 }
  0x52   :  { %231 = shalt.err (!%p228_p1)
}
  0x53   :  { %150 = dma.vmem_to_hbm [thread:$0]  %s148_s15, 64, %s315_s3, [#allocation3]  }
  0x54   :  { %236 = dma.done.wait [#allocation3], 64  }
  0x55   :  { %237 = vsyncadd [#allocation3], 4294967232 }
  0x56   :  { %154 = vsyncpa [#allocation3], 1 }
  0x57   :  { %155 = vsyncpa [#allocation4], 1 }
  0x58   :  { %156 = vsyncpa [#allocation5], 1 }

</bundles_post_ra>
